<compile_context>
chip_gen: v7x
topology: tpu7x:2x2x1
jax: 0.10.0
libtpu: 0.0.40
codegen_flags: <defaults>
</compile_context>

<pallas_src>
import jax
import jax.numpy as jnp
from jax.experimental import pallas as pl
from jax.experimental.pallas import tpu as pltpu

HIDDEN_PAD = 128       # hidden dim 100 zero-padded to a full lane width (pads are inert)
TARGET_TILE_B = 2048   # ~2048 batch elements per grid step (amortizes ~0.35 us/step)


def _round_up(n, m):
    return ((n + m - 1) // m) * m


def _pack_factor(s_dim):
    # Number of batch elements packed side-by-side into one 128-lane row.
    return max(1, min(8, 128 // s_dim))


def critic_kernel(x_ref, w1_ref, b1_ref, w2_ref, b2_ref, o_ref):
    # fc1: packed-batch matmul, standard MXU orientation, lane-dense x tile.
    # (For bit-closer fp32 parity one could add precision=lax.Precision.HIGHEST; the
    #  MXU is idle here so it would be nearly free, but default precision is kept.)
    h = jnp.dot(x_ref[...], w1_ref[...], preferred_element_type=jnp.float32)
    h = jnp.maximum(h + b1_ref[...], 0.0)                    # bias + ReLU in f32 (VPU)
    # fc2 on the (otherwise idle) MXU via the block-diagonal W2: (tile_r, P) result.
    v = jnp.dot(h, w2_ref[...], preferred_element_type=jnp.float32)
    o_ref[...] = (v + b2_ref[0, 0]).astype(o_ref.dtype)      # b2 scalar from SMEM


def prepare_critic_params(w1, b1, w2, b2):
    """One-time (per parameter update) weight re-layout.  Cache the result.

    w1: (S, H); b1: (H,) or (1, H); w2: (H, 1) or (H,); b2: scalar-like.
    Returns (w1_bd, b1_t, w2_bd, b2s) for critic_net_forward.
    """
    w1 = jnp.asarray(w1, jnp.float32)
    S, H = w1.shape
    P = _pack_factor(S)
    Hp = max(HIDDEN_PAD, _round_up(H, 128))

    w1p = jnp.zeros((S, Hp), jnp.float32).at[:, :H].set(w1)
    b1p = jnp.zeros((Hp,), jnp.float32).at[:H].set(jnp.asarray(b1, jnp.float32).reshape(-1))
    w2p = jnp.zeros((Hp, 1), jnp.float32).at[:H, :].set(
        jnp.asarray(w2, jnp.float32).reshape(H, 1))

    # P-way block-diagonal copies: packed row i of x holds P batch elements side by
    # side; diagonal block j of w1_bd / w2_bd handles element j of that pack.
    w1_bd = jax.scipy.linalg.block_diag(*([w1p] * P)) if P > 1 else w1p   # (P*S, P*Hp)
    w2_bd = jax.scipy.linalg.block_diag(*([w2p] * P)) if P > 1 else w2p   # (P*Hp, P)
    b1_t = jnp.tile(b1p[None, :], (1, P))                                  # (1, P*Hp)
    b2s = jnp.asarray(b2, jnp.float32).reshape(1, 1)
    return w1_bd, b1_t, w2_bd, b2s


@jax.jit
def critic_net_forward(x, params):
    """relu(x @ w1 + b1) @ w2 + b2  ->  (B, 1) float32, single Pallas kernel launch."""
    w1_bd, b1_t, w2_bd, b2s = params
    B, S = x.shape
    PS, PHp = w1_bd.shape
    P = PS // S
    assert PS == P * S and w2_bd.shape == (PHp, P)

    # ---- static tiling math (shapes are static under jit) --------------------
    unit = 8 * P                                  # batch granularity (8 packed sublane rows)
    n_units = pl.cdiv(max(B, 1), unit)
    target_units = max(1, TARGET_TILE_B // unit)
    num_steps = pl.cdiv(n_units, target_units)
    if n_units >= 2 and num_steps < 2:
        num_steps = 2                             # >=2 grid steps so both v7x TCs get work
    units_per_tile = pl.cdiv(n_units, num_steps)
    tile_b = units_per_tile * unit                # batch elements per grid step
    Bp = tile_b * num_steps                       # minimal padding (not rounded to tile_b of 2048)
    tile_r = tile_b // P                          # packed rows per tile (multiple of 8)
    Rp = Bp // P

    xp = x.astype(jnp.float32)
    if Bp != B:
        xp = jnp.pad(xp, ((0, Bp - B), (0, 0)))
    xp = xp.reshape(Rp, P * S)                    # free contiguous reshape: P elems / row

    out = pl.pallas_call(
        critic_kernel,
        out_shape=jax.ShapeDtypeStruct((Rp, P), jnp.float32),
        grid=(num_steps,),
        in_specs=[
            pl.BlockSpec((tile_r, PS), lambda i: (i, 0)),        # packed x tiles (lane-dense)
            pl.BlockSpec((PS, PHp), lambda i: (0, 0)),           # block-diag W1, VMEM-resident
            pl.BlockSpec((1, PHp), lambda i: (0, 0)),            # tiled b1 row, resident
            pl.BlockSpec((PHp, P), lambda i: (0, 0)),            # block-diag W2, resident
            pl.BlockSpec(memory_space=pltpu.MemorySpace.SMEM),   # b2 scalar via SMEM
        ],
        out_specs=pl.BlockSpec((tile_r, P), lambda i: (i, 0)),
        compiler_params=pltpu.CompilerParams(
            dimension_semantics=("parallel",),                   # batch tiles independent
        ),
    )(xp, w1_bd, b1_t, w2_bd, b2s)

    # Padded rows are sliced off here; do not reuse the raw (Rp, P) kernel output.
    return out.reshape(Bp, 1)[:B]


def init_params(key, s_dim, hidden=100):
    # Mimic PyTorch nn.Linear default init: U(-1/sqrt(fan_in), 1/sqrt(fan_in)).
    k1, k2, k3, k4 = jax.random.split(key, 4)
    bound1 = 1.0 / jnp.sqrt(jnp.float32(s_dim))
    w1 = jax.random.uniform(k1, (s_dim, hidden), jnp.float32, -bound1, bound1)
    b1 = jax.random.uniform(k2, (hidden,), jnp.float32, -bound1, bound1)
    bound2 = 1.0 / jnp.sqrt(jnp.float32(hidden))
    w2 = jax.random.uniform(k3, (hidden, 1), jnp.float32, -bound2, bound2)
    b2 = jax.random.uniform(k4, (1, 1), jnp.float32, -bound2, bound2)
    return w1, b1, w2, b2


if __name__ == "__main__":
    key = jax.random.PRNGKey(0)
    kx, kp, kx2 = jax.random.split(key, 3)

    s_dim, hidden = 16, 100                     # CriticNet(s_dim=16): fc1 16->100, fc2 100->1
    w1, b1, w2, b2 = init_params(kp, s_dim, hidden)

    # One-time weight re-layout (cache across forward calls / re-run per param update).
    params = prepare_critic_params(w1, b1, w2, b2)
    params = jax.tree_util.tree_map(jax.block_until_ready, params)

    # Small batch.
    batch = 8
    x = jax.random.normal(kx, (batch, s_dim), jnp.float32)
    out = jax.block_until_ready(critic_net_forward(x, params))
    ref = jnp.maximum(x @ w1 + b1, 0.0) @ w2 + b2
    assert out.shape == (batch, 1)
    # Tolerance covers default-precision MXU (bf16-rounded inputs) vs XLA f32 reference.
    assert jnp.allclose(out, ref, atol=5e-3, rtol=5e-3)

    # Awkward batch size: exercises minimal padding + a 2-step "parallel" grid.
    batch2 = 300
    x2 = jax.random.normal(kx2, (batch2, s_dim), jnp.float32)
    out2 = jax.block_until_ready(critic_net_forward(x2, params))
    ref2 = jnp.maximum(x2 @ w1 + b1, 0.0) @ w2 + b2
    assert out2.shape == (batch2, 1)
    assert jnp.allclose(out2, ref2, atol=5e-3, rtol=5e-3)

    print("KERNEL_OK")
</pallas_src>

<mosaic_0001>
module attributes {stable_mosaic.version = 11 : i64} {
  func.func @critic_kernel(%arg0: i32, %arg1: memref<8x128xf32, #tpu.memory_space<vmem>>, %arg2: memref<128x1024xf32, #tpu.memory_space<vmem>>, %arg3: memref<1x1024xf32, #tpu.memory_space<vmem>>, %arg4: memref<1024x8xf32, #tpu.memory_space<vmem>>, %arg5: memref<1x1xf32, #tpu.memory_space<smem>>, %arg6: memref<8x8xf32, #tpu.memory_space<vmem>>) attributes {dimension_semantics = [#tpu.dimension_semantics<parallel>], iteration_bounds = array<i64: 1>, scalar_prefetch = 0 : i64, scratch_operands = 0 : i64, tpu.core_type = #tpu.core_type<tc>, window_params = [{transform_indices = @transform_0, window_bounds = array<i64: 8, 128>}, {pipeline_mode = #tpu.pipeline_mode<synchronous>, transform_indices = @transform_1, window_bounds = array<i64: 128, 1024>}, {pipeline_mode = #tpu.pipeline_mode<synchronous>, transform_indices = @transform_2, window_bounds = array<i64: 1, 1024>}, {pipeline_mode = #tpu.pipeline_mode<synchronous>, transform_indices = @transform_3, window_bounds = array<i64: 1024, 8>}, {transform_indices = @transform_4, window_bounds = array<i64: 1, 1>}, {transform_indices = @transform_5, window_bounds = array<i64: 8, 8>}]} {
    %c0 = arith.constant 0 : index
    %c0_0 = arith.constant 0 : index
    %0 = vector.load %arg1[%c0, %c0_0] : memref<8x128xf32, #tpu.memory_space<vmem>>, vector<8x128xf32>
    %c0_1 = arith.constant 0 : index
    %c0_2 = arith.constant 0 : index
    %1 = vector.load %arg2[%c0_1, %c0_2] : memref<128x1024xf32, #tpu.memory_space<vmem>>, vector<128x1024xf32>
    %cst = arith.constant dense<0.000000e+00> : vector<8x1024xf32>
    %2 = tpu.matmul %0, %1, %cst {dimension_numbers = #tpu.dot_dimension_numbers<[1], [0], [0], [1], [0, 0, 1, 1], [], []>} : vector<8x128xf32>, vector<128x1024xf32>, vector<8x1024xf32> -> vector<8x1024xf32>
    %c0_3 = arith.constant 0 : index
    %c0_4 = arith.constant 0 : index
    %3 = vector.load %arg3[%c0_3, %c0_4] : memref<1x1024xf32, #tpu.memory_space<vmem>>, vector<1x1024xf32>
    %4 = vector.broadcast %3 : vector<1x1024xf32> to vector<8x1024xf32>
    %5 = arith.addf %2, %4 : vector<8x1024xf32>
    %cst_5 = arith.constant 0.000000e+00 : f32
    %6 = vector.broadcast %cst_5 : f32 to vector<8x1024xf32>
    %7 = arith.maximumf %5, %6 : vector<8x1024xf32>
    %c0_6 = arith.constant 0 : index
    %c0_7 = arith.constant 0 : index
    %8 = vector.load %arg4[%c0_6, %c0_7] : memref<1024x8xf32, #tpu.memory_space<vmem>>, vector<1024x8xf32>
    %cst_8 = arith.constant dense<0.000000e+00> : vector<8x8xf32>
    %9 = tpu.matmul %7, %8, %cst_8 {dimension_numbers = #tpu.dot_dimension_numbers<[1], [0], [0], [1], [0, 0, 1, 1], [], []>} : vector<8x1024xf32>, vector<1024x8xf32>, vector<8x8xf32> -> vector<8x8xf32>
    %c0_9 = arith.constant 0 : index
    %c0_10 = arith.constant 0 : index
    %10 = memref.load %arg5[%c0_9, %c0_10] : memref<1x1xf32, #tpu.memory_space<smem>>
    %11 = vector.broadcast %10 : f32 to vector<8x8xf32>
    %12 = arith.addf %9, %11 : vector<8x8xf32>
    %c0_11 = arith.constant 0 : index
    %c0_12 = arith.constant 0 : index
    %13 = vector.load %arg6[%c0_11, %c0_12] : memref<8x8xf32, #tpu.memory_space<vmem>>, vector<8x8xf32>
    tpu.vector_store %arg6[%c0_11, %c0_12], %12 {strides = array<i32>} : memref<8x8xf32, #tpu.memory_space<vmem>>, vector<8x8xf32>,
    return
  }
  func.func @transform_0(%arg0: i32) -> (i32, i32) {
    %c0_i32 = arith.constant 0 : i32
    %c0_i32_0 = arith.constant 0 : i32
    return %arg0, %c0_i32 : i32, i32
  }
  func.func @transform_1(%arg0: i32) -> (i32, i32) {
    %c0_i32 = arith.constant 0 : i32
    %c0_i32_0 = arith.constant 0 : i32
    %c0_i32_1 = arith.constant 0 : i32
    return %c0_i32, %c0_i32_0 : i32, i32
  }
  func.func @transform_2(%arg0: i32) -> (i32, i32) {
    %c0_i32 = arith.constant 0 : i32
    %c0_i32_0 = arith.constant 0 : i32
    %c0_i32_1 = arith.constant 0 : i32
    return %c0_i32, %c0_i32_0 : i32, i32
  }
  func.func @transform_3(%arg0: i32) -> (i32, i32) {
    %c0_i32 = arith.constant 0 : i32
    %c0_i32_0 = arith.constant 0 : i32
    %c0_i32_1 = arith.constant 0 : i32
    return %c0_i32, %c0_i32_0 : i32, i32
  }
  func.func @transform_4(%arg0: i32) -> (i32, i32) {
    %c0_i32 = arith.constant 0 : i32
    %c0_i32_0 = arith.constant 0 : i32
    %c0_i32_1 = arith.constant 0 : i32
    return %c0_i32, %c0_i32_0 : i32, i32
  }
  func.func @transform_5(%arg0: i32) -> (i32, i32) {
    %c0_i32 = arith.constant 0 : i32
    %c0_i32_0 = arith.constant 0 : i32
    return %arg0, %c0_i32 : i32, i32
  }
}

</mosaic_0001>

<bundles_post_ra>
// kernel: critic_net_forward.1
= control target key start
LH: loop header
LB: loop body
LE: loop exit
PB: predicated region body
PF: predicated region fallthrough
CT: control target
= control target key end

     0   :  { %v1297_v3 = vmov 0.0   ;;  %vm894_vm0 = vcmask 64512   ;;  %s2138_s1 = inlined_call_operand.vmem [shape: f32[128,1024], index: 1, kind: input, shape index: {}]   ;;  %s2139_s0 = inlined_call_operand.vmem [shape: f32[8,128], index: 0, kind: input, shape index: {}]   ;;  %s2140_s3 = inlined_call_operand.vmem [shape: f32[1024,8], index: 3, kind: input, shape index: {}]   ;;  %s2141_s2 = inlined_call_operand.vmem [shape: f32[1,1024], index: 2, kind: input, shape index: {}]   ;;  %s2142_s4 = inlined_call_operand.<no memory space> [shape: f32[1,1], index: 4, kind: input, shape index: {}]   ;;  %s2143_s5 = inlined_call_operand.vmem [shape: f32[8,8], index: 5, kind: output, shape index: {}]  }
   0x1   :  { %v23_v0 = vld [vmem:[%s2138_s1 + $0x8] sm:$0xff]  ;;  %v25_v2 = vld [vmem:[%s2138_s1 + $0x18] sm:$0xff]  ;;  %256 = vmatprep.mubr.f32.mxu0 %v1297_v3  ;;  %327 = vmatprep.mubr.f32.mxu1 %v1297_v3  ;;  %v22_v6 = vld [vmem:[%s2138_s1] sm:$0xff] }
   0x2   :  { %v31_v1 = vld [vmem:[%s2138_s1 + $0x48] sm:$0xff]  ;;  %v33_v5 = vld [vmem:[%s2138_s1 + $0x58] sm:$0xff]  ;;  %v30_v7 = vld [vmem:[%s2138_s1 + $0x40] sm:$0xff] }
   0x3   :  { %v1040_v4 = vpack.c.bf16 %v31_v1, %v23_v0  ;;  %v1072_v8 = vpack.c.bf16 %v33_v5, %v25_v2  ;;  %v1042_v9 = vpack.c.bf16 %v30_v7, %v22_v6  ;;  %v24_v10 = vld [vmem:[%s2138_s1 + $0x10] sm:$0xff]  ;;  %v39_v12 = vld [vmem:[%s2138_s1 + $0x88] sm:$0xff]  ;;  %v41_v15 = vld [vmem:[%s2138_s1 + $0x98] sm:$0xff] }
   0x4   :  { %v32_v11 = vld [vmem:[%s2138_s1 + $0x50] sm:$0xff]  ;;  %v47_v14 = vld [vmem:[%s2138_s1 + $0xc8] sm:$0xff]  ;;  %v49_v16 = vld [vmem:[%s2138_s1 + $0xd8] sm:$0xff] }
   0x5   :  { %1041 = vmatprep.subr.bf16.mxu0 %v1040_v4  ;;  %v1074_v13 = vpack.c.bf16 %v32_v11, %v24_v10  ;;  %1073 = vmatprep.subr.bf16.mxu1 %v1072_v8  ;;  %v1044_v17 = vpack.c.bf16 %v47_v14, %v39_v12  ;;  %v1076_v18 = vpack.c.bf16 %v49_v16, %v41_v15  ;;  %v38_v19 = vld [vmem:[%s2138_s1 + $0x80] sm:$0xff]  ;;  %v40_v21 = vld [vmem:[%s2138_s1 + $0x90] sm:$0xff]  ;;  %v55_v24 = vld [vmem:[%s2138_s1 + $0x108] sm:$0xff] }
   0x6   :  { %1043 = vmatpush1.bf16.msra.mxu0 %v1042_v9  ;;  %v46_v20 = vld [vmem:[%s2138_s1 + $0xc0] sm:$0xff]  ;;  %v48_v23 = vld [vmem:[%s2138_s1 + $0xd0] sm:$0xff]  ;;  %v63_v25 = vld [vmem:[%s2138_s1 + $0x148] sm:$0xff] }
   0x7   :  { %1075 = vmatpush1.bf16.msra.mxu1 %v1074_v13  ;;  %v1046_v22 = vpack.c.bf16 %v46_v20, %v38_v19  ;;  %1045 = vmatprep.subr.bf16.mxu0 %v1044_v17  ;;  %v1078_v26 = vpack.c.bf16 %v48_v23, %v40_v21  ;;  %v1048_v27 = vpack.c.bf16 %v63_v25, %v55_v24  ;;  %v57_v28 = vld [vmem:[%s2138_s1 + $0x118] sm:$0xff]  ;;  %v54_v30 = vld [vmem:[%s2138_s1 + $0x100] sm:$0xff]  ;;  %v56_v33 = vld [vmem:[%s2138_s1 + $0x110] sm:$0xff] }
   0x8   :  { %1077 = vmatprep.subr.bf16.mxu1 %v1076_v18  ;;  %v65_v29 = vld [vmem:[%s2138_s1 + $0x158] sm:$0xff]  ;;  %v62_v32 = vld [vmem:[%s2138_s1 + $0x140] sm:$0xff]  ;;  %v64_v34 = vld [vmem:[%s2138_s1 + $0x150] sm:$0xff] }
   0x9   :  { %v1080_v31 = vpack.c.bf16 %v65_v29, %v57_v28  ;;  %v1050_v35 = vpack.c.bf16 %v62_v32, %v54_v30  ;;  %v71_v36 = vld [vmem:[%s2138_s1 + $0x188] sm:$0xff]  ;;  %v73_v38 = vld [vmem:[%s2138_s1 + $0x198] sm:$0xff]  ;;  %v1082_v39 = vpack.c.bf16 %v64_v34, %v56_v33  ;;  %v70_v42 = vld [vmem:[%s2138_s1 + $0x180] sm:$0xff] }
   0xa   :  { %1047 = vmatpush1.bf16.msra.mxu0 %v1046_v22  ;;  %v79_v37 = vld [vmem:[%s2138_s1 + $0x1c8] sm:$0xff]  ;;  %v81_v41 = vld [vmem:[%s2138_s1 + $0x1d8] sm:$0xff]  ;;  %v78_v43 = vld [vmem:[%s2138_s1 + $0x1c0] sm:$0xff] }
   0xb   :  { %1079 = vmatpush1.bf16.msra.mxu1 %v1078_v26  ;;  %1049 = vmatprep.subr.bf16.mxu0 %v1048_v27  ;;  %v1052_v40 = vpack.c.bf16 %v79_v37, %v71_v36  ;;  %v1084_v44 = vpack.c.bf16 %v81_v41, %v73_v38  ;;  %v72_v45 = vld [vmem:[%s2138_s1 + $0x190] sm:$0xff]  ;;  %v87_v47 = vld [vmem:[%s2138_s1 + $0x208] sm:$0xff]  ;;  %v89_v49 = vld [vmem:[%s2138_s1 + $0x218] sm:$0xff]  ;;  %v1054_v51 = vpack.c.bf16 %v78_v43, %v70_v42 }
   0xc   :  { %1081 = vmatprep.subr.bf16.mxu1 %v1080_v31  ;;  %v80_v46 = vld [vmem:[%s2138_s1 + $0x1d0] sm:$0xff]  ;;  %v95_v48 = vld [vmem:[%s2138_s1 + $0x248] sm:$0xff]  ;;  %v97_v50 = vld [vmem:[%s2138_s1 + $0x258] sm:$0xff] }
   0xd   :  { %v1086_v52 = vpack.c.bf16 %v80_v46, %v72_v45  ;;  %v1056_v53 = vpack.c.bf16 %v95_v48, %v87_v47  ;;  %v86_v54 = vld [vmem:[%s2138_s1 + $0x200] sm:$0xff]  ;;  %v88_v56 = vld [vmem:[%s2138_s1 + $0x210] sm:$0xff]  ;;  %v1088_v57 = vpack.c.bf16 %v97_v50, %v89_v49  ;;  %v103_v59 = vld [vmem:[%s2138_s1 + $0x288] sm:$0xff] }
   0xe   :  { %1051 = vmatpush1.bf16.msra.mxu0 %v1050_v35  ;;  %v94_v55 = vld [vmem:[%s2138_s1 + $0x240] sm:$0xff]  ;;  %v96_v58 = vld [vmem:[%s2138_s1 + $0x250] sm:$0xff]  ;;  %v111_v60 = vld [vmem:[%s2138_s1 + $0x2c8] sm:$0xff] }
   0xf   :  { %1083 = vmatpush1.bf16.msra.mxu1 %v1082_v39  ;;  %1053 = vmatprep.subr.bf16.mxu0 %v1052_v40  ;;  %v105_v61 = vld [vmem:[%s2138_s1 + $0x298] sm:$0xff]  ;;  %v1058_v63 = vpack.c.bf16 %v94_v55, %v86_v54  ;;  %v1090_v0 = vpack.c.bf16 %v96_v58, %v88_v56  ;;  %v1060_v1 = vpack.c.bf16 %v111_v60, %v103_v59  ;;  %v102_v2 = vld [vmem:[%s2138_s1 + $0x280] sm:$0xff]  ;;  %v104_v5 = vld [vmem:[%s2138_s1 + $0x290] sm:$0xff] }
  0x10   :  { %1085 = vmatprep.subr.bf16.mxu1 %v1084_v44  ;;  %v113_v62 = vld [vmem:[%s2138_s1 + $0x2d8] sm:$0xff]  ;;  %v110_v4 = vld [vmem:[%s2138_s1 + $0x2c0] sm:$0xff]  ;;  %v112_v7 = vld [vmem:[%s2138_s1 + $0x2d0] sm:$0xff] }
  0x11   :  { %v1092_v6 = vpack.c.bf16 %v113_v62, %v105_v61  ;;  %v119_v8 = vld [vmem:[%s2138_s1 + $0x308] sm:$0xff]  ;;  %v121_v10 = vld [vmem:[%s2138_s1 + $0x318] sm:$0xff]  ;;  %v1062_v12 = vpack.c.bf16 %v110_v4, %v102_v2  ;;  %v1094_v13 = vpack.c.bf16 %v112_v7, %v104_v5  ;;  %v118_v15 = vld [vmem:[%s2138_s1 + $0x300] sm:$0xff] }
  0x12   :  { %1055 = vmatpush1.bf16.msra.mxu0 %v1054_v51  ;;  %v127_v9 = vld [vmem:[%s2138_s1 + $0x348] sm:$0xff]  ;;  %v129_v11 = vld [vmem:[%s2138_s1 + $0x358] sm:$0xff]  ;;  %v126_v16 = vld [vmem:[%s2138_s1 + $0x340] sm:$0xff] }
  0x13   :  { %1087 = vmatpush1.bf16.msra.mxu1 %v1086_v52  ;;  %1057 = vmatprep.subr.bf16.mxu0 %v1056_v53  ;;  %v1064_v14 = vpack.c.bf16 %v127_v9, %v119_v8  ;;  %v120_v17 = vld [vmem:[%s2138_s1 + $0x310] sm:$0xff]  ;;  %v1096_v18 = vpack.c.bf16 %v129_v11, %v121_v10  ;;  %v135_v20 = vld [vmem:[%s2138_s1 + $0x388] sm:$0xff]  ;;  %v137_v22 = vld [vmem:[%s2138_s1 + $0x398] sm:$0xff]  ;;  %v1066_v24 = vpack.c.bf16 %v126_v16, %v118_v15 }
  0x14   :  { %1089 = vmatprep.subr.bf16.mxu1 %v1088_v57  ;;  %v128_v19 = vld [vmem:[%s2138_s1 + $0x350] sm:$0xff]  ;;  %v143_v21 = vld [vmem:[%s2138_s1 + $0x3c8] sm:$0xff]  ;;  %v145_v23 = vld [vmem:[%s2138_s1 + $0x3d8] sm:$0xff] }
  0x15   :  { %v1098_v25 = vpack.c.bf16 %v128_v19, %v120_v17  ;;  %v1068_v26 = vpack.c.bf16 %v143_v21, %v135_v20  ;;  %v134_v27 = vld [vmem:[%s2138_s1 + $0x380] sm:$0xff]  ;;  %v136_v29 = vld [vmem:[%s2138_s1 + $0x390] sm:$0xff]  ;;  %v1100_v30 = vpack.c.bf16 %v145_v23, %v137_v22  ;;  %v27_v32 = vld [vmem:[%s2138_s1 + $0x28] sm:$0xff] }
  0x16   :  { %1059 = vmatpush1.bf16.msra.mxu0 %v1058_v63  ;;  %v142_v28 = vld [vmem:[%s2138_s1 + $0x3c0] sm:$0xff]  ;;  %v144_v31 = vld [vmem:[%s2138_s1 + $0x3d0] sm:$0xff]  ;;  %v35_v33 = vld [vmem:[%s2138_s1 + $0x68] sm:$0xff] }
  0x17   :  { %1091 = vmatpush1.bf16.msra.mxu1 %v1090_v0  ;;  %1061 = vmatprep.subr.bf16.mxu0 %v1060_v1  ;;  %v29_v34 = vld [vmem:[%s2138_s1 + $0x38] sm:$0xff]  ;;  %v1070_v36 = vpack.c.bf16 %v142_v28, %v134_v27  ;;  %v1102_v37 = vpack.c.bf16 %v144_v31, %v136_v29  ;;  %v1104_v38 = vpack.c.bf16 %v35_v33, %v27_v32  ;;  %v26_v39 = vld [vmem:[%s2138_s1 + $0x20] sm:$0xff]  ;;  %v28_v41 = vld [vmem:[%s2138_s1 + $0x30] sm:$0xff] }
  0x18   :  { %1093 = vmatprep.subr.bf16.mxu1 %v1092_v6  ;;  %v37_v35 = vld [vmem:[%s2138_s1 + $0x78] sm:$0xff]  ;;  %v34_v40 = vld [vmem:[%s2138_s1 + $0x60] sm:$0xff]  ;;  %v36_v43 = vld [vmem:[%s2138_s1 + $0x70] sm:$0xff] }
  0x19   :  { %v1136_v42 = vpack.c.bf16 %v37_v35, %v29_v34  ;;  %v43_v44 = vld [vmem:[%s2138_s1 + $0xa8] sm:$0xff]  ;;  %v45_v46 = vld [vmem:[%s2138_s1 + $0xb8] sm:$0xff]  ;;  %v1561_v48 = vld [vmem:[%s2139_s0] sm:$0xff]  ;;  %v1106_v49 = vpack.c.bf16 %v34_v40, %v26_v39  ;;  %v1138_v50 = vpack.c.bf16 %v36_v43, %v28_v41 }
  0x1a   :  { %1063 = vmatpush1.bf16.msra.mxu0 %v1062_v12  ;;  %v51_v45 = vld [vmem:[%s2138_s1 + $0xe8] sm:$0xff]  ;;  %v53_v47 = vld [vmem:[%s2138_s1 + $0xf8] sm:$0xff]  ;;  %v42_v52 = vld [vmem:[%s2138_s1 + $0xa0] sm:$0xff] }
  0x1b   :  { %1095 = vmatpush1.bf16.msra.mxu1 %v1094_v13  ;;  %1065 = vmatprep.subr.bf16.mxu0 %v1064_v14  ;;  %v1108_v51 = vpack.c.bf16 %v51_v45, %v43_v44  ;;  %v50_v53 = vld [vmem:[%s2138_s1 + $0xe0] sm:$0xff]  ;;  %v44_v54 = vld [vmem:[%s2138_s1 + $0xb0] sm:$0xff]  ;;  %v1140_v55 = vpack.c.bf16 %v53_v47, %v45_v46  ;;  %v59_v57 = vld [vmem:[%s2138_s1 + $0x128] sm:$0xff] }
  0x1c   :  { %1097 = vmatprep.subr.bf16.mxu1 %v1096_v18  ;;  %v52_v56 = vld [vmem:[%s2138_s1 + $0xf0] sm:$0xff]  ;;  %v67_v58 = vld [vmem:[%s2138_s1 + $0x168] sm:$0xff]  ;;  %v61_v59 = vld [vmem:[%s2138_s1 + $0x138] sm:$0xff]  ;;  %v1110_v61 = vpack.c.bf16 %v50_v53, %v42_v52 }
  0x1d   :  { %v69_v60 = vld [vmem:[%s2138_s1 + $0x178] sm:$0xff]  ;;  %v1142_v62 = vpack.c.bf16 %v52_v56, %v44_v54  ;;  %v1112_v63 = vpack.c.bf16 %v67_v58, %v59_v57  ;;  %v58_v0 = vld [vmem:[%s2138_s1 + $0x120] sm:$0xff]  ;;  %v60_v2 = vld [vmem:[%s2138_s1 + $0x130] sm:$0xff] }
  0x1e   :  { %1067 = vmatpush1.bf16.msra.mxu0 %v1066_v24  ;;  %v66_v1 = vld [vmem:[%s2138_s1 + $0x160] sm:$0xff]  ;;  %v1144_v4 = vpack.c.bf16 %v69_v60, %v61_v59  ;;  %v68_v5 = vld [vmem:[%s2138_s1 + $0x170] sm:$0xff]  ;;  %v75_v6 = vld [vmem:[%s2138_s1 + $0x1a8] sm:$0xff] }
  0x1f   :  { %1099 = vmatpush1.bf16.msra.mxu1 %v1098_v25  ;;  %1069 = vmatprep.subr.bf16.mxu0 %v1068_v26  ;;  %v83_v7 = vld [vmem:[%s2138_s1 + $0x1e8] sm:$0xff]  ;;  %v77_v8 = vld [vmem:[%s2138_s1 + $0x1b8] sm:$0xff]  ;;  %v1114_v10 = vpack.c.bf16 %v66_v1, %v58_v0  ;;  %v1146_v11 = vpack.c.bf16 %v68_v5, %v60_v2  ;;  %v74_v13 = vld [vmem:[%s2138_s1 + $0x1a0] sm:$0xff] }
  0x20   :  { %1101 = vmatprep.subr.bf16.mxu1 %v1100_v30  ;;  %v85_v9 = vld [vmem:[%s2138_s1 + $0x1f8] sm:$0xff]  ;;  %v1116_v12 = vpack.c.bf16 %v83_v7, %v75_v6  ;;  %v82_v14 = vld [vmem:[%s2138_s1 + $0x1e0] sm:$0xff]  ;;  %v76_v15 = vld [vmem:[%s2138_s1 + $0x1b0] sm:$0xff] }
  0x21   :  { %v84_v16 = vld [vmem:[%s2138_s1 + $0x1f0] sm:$0xff]  ;;  %v91_v17 = vld [vmem:[%s2138_s1 + $0x228] sm:$0xff]  ;;  %v93_v19 = vld [vmem:[%s2138_s1 + $0x238] sm:$0xff]  ;;  %v1118_v21 = vpack.c.bf16 %v82_v14, %v74_v13 }
  0x22   :  { %1071 = vmatpush1.bf16.msra.mxu0 %v1070_v36  ;;  %v99_v18 = vld [vmem:[%s2138_s1 + $0x268] sm:$0xff]  ;;  %v101_v20 = vld [vmem:[%s2138_s1 + $0x278] sm:$0xff]  ;;  %v1150_v22 = vpack.c.bf16 %v84_v16, %v76_v15  ;;  %v90_v24 = vld [vmem:[%s2138_s1 + $0x220] sm:$0xff] }
  0x23   :  { %1103 = vmatpush1.bf16.msra.mxu1 %v1102_v37  ;;  %1105 = vmatprep.subr.bf16.mxu0 %v1104_v38  ;;  %v1120_v23 = vpack.c.bf16 %v99_v18, %v91_v17  ;;  %v98_v25 = vld [vmem:[%s2138_s1 + $0x260] sm:$0xff]  ;;  %v92_v26 = vld [vmem:[%s2138_s1 + $0x230] sm:$0xff]  ;;  %v1152_v27 = vpack.c.bf16 %v101_v20, %v93_v19  ;;  %v107_v29 = vld [vmem:[%s2138_s1 + $0x2a8] sm:$0xff] }
  0x24   :  { %1137 = vmatprep.subr.bf16.mxu1 %v1136_v42  ;;  %v100_v28 = vld [vmem:[%s2138_s1 + $0x270] sm:$0xff]  ;;  %v115_v30 = vld [vmem:[%s2138_s1 + $0x2e8] sm:$0xff]  ;;  %v109_v31 = vld [vmem:[%s2138_s1 + $0x2b8] sm:$0xff]  ;;  %v1122_v33 = vpack.c.bf16 %v98_v25, %v90_v24 }
  0x25   :  { %257 = vmatmul.mubr.f32.vlgmr.msra.gmra.mrb[0].mxu0 %v1561_v48  ;;  %v117_v32 = vld [vmem:[%s2138_s1 + $0x2f8] sm:$0xff]  ;;  %v1154_v34 = vpack.c.bf16 %v100_v28, %v92_v26  ;;  %v1124_v35 = vpack.c.bf16 %v115_v30, %v107_v29  ;;  %v106_v36 = vld [vmem:[%s2138_s1 + $0x2a0] sm:$0xff]  ;;  %v108_v38 = vld [vmem:[%s2138_s1 + $0x2b0] sm:$0xff] }
  0x26   :  { %328 = vmatmul.mubr.f32.vlgmr.msra.gmra.mrb[0].mxu1 %v1561_v48  ;;  %1107 = vmatpush1.bf16.msra.mxu0 %v1106_v49  ;;  %v114_v37 = vld [vmem:[%s2138_s1 + $0x2e0] sm:$0xff]  ;;  %v1156_v39 = vpack.c.bf16 %v117_v32, %v109_v31  ;;  %v116_v40 = vld [vmem:[%s2138_s1 + $0x2f0] sm:$0xff]  ;;  %v123_v41 = vld [vmem:[%s2138_s1 + $0x328] sm:$0xff] }
  0x27   :  { %1139 = vmatpush1.bf16.msra.mxu1 %v1138_v50  ;;  %1109 = vmatprep.subr.bf16.mxu0 %v1108_v51  ;;  %v131_v42 = vld [vmem:[%s2138_s1 + $0x368] sm:$0xff]  ;;  %v125_v43 = vld [vmem:[%s2138_s1 + $0x338] sm:$0xff]  ;;  %v1126_v45 = vpack.c.bf16 %v114_v37, %v106_v36  ;;  %v1158_v46 = vpack.c.bf16 %v116_v40, %v108_v38  ;;  %v122_v49 = vld [vmem:[%s2138_s1 + $0x320] sm:$0xff] }
  0x28   :  { %1141 = vmatprep.subr.bf16.mxu1 %v1140_v55  ;;  %398 = vmatprep.mubr.f32.mxu0 %v1297_v3  ;;  %v133_v44 = vld [vmem:[%s2138_s1 + $0x378] sm:$0xff]  ;;  %v1128_v47 = vpack.c.bf16 %v131_v42, %v123_v41  ;;  %v130_v50 = vld [vmem:[%s2138_s1 + $0x360] sm:$0xff]  ;;  %v124_v51 = vld [vmem:[%s2138_s1 + $0x330] sm:$0xff] }
  0x29   :  { %469 = vmatprep.mubr.f32.mxu1 %v1297_v3  ;;  %v1148_v3 = vpack.c.bf16 %v85_v9, %v77_v8  ;;  %v1160_v52 = vpack.c.bf16 %v133_v44, %v125_v43  ;;  %v132_v53 = vld [vmem:[%s2138_s1 + $0x370] sm:$0xff]  ;;  %v139_v54 = vld [vmem:[%s2138_s1 + $0x3a8] sm:$0xff]  ;;  %v141_v56 = vld [vmem:[%s2138_s1 + $0x3b8] sm:$0xff]  ;;  %v1130_v58 = vpack.c.bf16 %v130_v50, %v122_v49 }
  0x2a   :  { %1111 = vmatpush1.bf16.msra.mxu0 %v1110_v61  ;;  %v147_v55 = vld [vmem:[%s2138_s1 + $0x3e8] sm:$0xff]  ;;  %v149_v57 = vld [vmem:[%s2138_s1 + $0x3f8] sm:$0xff]  ;;  %v1162_v59 = vpack.c.bf16 %v132_v53, %v124_v51  ;;  %v138_v61 = vld [vmem:[%s2138_s1 + $0x3a0] sm:$0xff] }
  0x2b   :  { %1143 = vmatpush1.bf16.msra.mxu1 %v1142_v62  ;;  %1113 = vmatprep.subr.bf16.mxu0 %v1112_v63  ;;  %v1132_v60 = vpack.c.bf16 %v147_v55, %v139_v54  ;;  %v146_v62 = vld [vmem:[%s2138_s1 + $0x3e0] sm:$0xff]  ;;  %v140_v63 = vld [vmem:[%s2138_s1 + $0x3b0] sm:$0xff]  ;;  %v1164_v0 = vpack.c.bf16 %v149_v57, %v141_v56  ;;  %v533_v6 = vld [vmem:[%s2140_s3 + $0x188] sm:$0xff] }
  0x2c   :  { %1145 = vmatprep.subr.bf16.mxu1 %v1144_v4  ;;  %v148_v1 = vld [vmem:[%s2138_s1 + $0x3f0] sm:$0xff]  ;;  %v500_v2 = vld [vmem:[%s2140_s3 + $0x80] sm:$0xff]  ;;  %v501_v4 = vld [vmem:[%s2140_s3 + $0x88] sm:$0xff]  ;;  %v1134_v7 = vpack.c.bf16 %v146_v62, %v138_v61 }
  0x2d   :  { %v532_v5 = vld [vmem:[%s2140_s3 + $0x180] sm:$0xff]  ;;  %v1166_v8 = vpack.c.bf16 %v148_v1, %v140_v63  ;;  %v1168_v9 = vpack.c.bf16 %v501_v4, %v500_v2  ;;  %v517_v14 = vld [vmem:[%s2140_s3 + $0x108] sm:$0xff]  ;;  %v502_v15 = vld [vmem:[%s2140_s3 + $0x90] sm:$0xff] }
  0x2e   :  { %1115 = vmatpush1.bf16.msra.mxu0 %v1114_v10  ;;  %v484_v10 = vld [vmem:[%s2140_s3] sm:$0xff]  ;;  %v1200_v13 = vpack.c.bf16 %v533_v6, %v532_v5  ;;  %v534_v16 = vld [vmem:[%s2140_s3 + $0x190] sm:$0xff]  ;;  %v535_v17 = vld [vmem:[%s2140_s3 + $0x198] sm:$0xff] }
  0x2f   :  { %1147 = vmatpush1.bf16.msra.mxu1 %v1146_v11  ;;  %1117 = vmatprep.subr.bf16.mxu0 %v1116_v12  ;;  %v485_v11 = vld [vmem:[%s2140_s3 + $0x8] sm:$0xff]  ;;  %v516_v12 = vld [vmem:[%s2140_s3 + $0x100] sm:$0xff]  ;;  %v1204_v24 = vpack.c.bf16 %v535_v17, %v534_v16  ;;  %v519_v25 = vld [vmem:[%s2140_s3 + $0x118] sm:$0xff] }
  0x30   :  { %1149 = vmatprep.subr.bf16.mxu1 %v1148_v3  ;;  %v503_v3 = vld [vmem:[%s2140_s3 + $0x98] sm:$0xff]  ;;  %v1170_v18 = vpack.c.bf16 %v485_v11, %v484_v10  ;;  %v1202_v19 = vpack.c.bf16 %v517_v14, %v516_v12  ;;  %v504_v26 = vld [vmem:[%s2140_s3 + $0xa0] sm:$0xff]  ;;  %v537_v29 = vld [vmem:[%s2140_s3 + $0x1a8] sm:$0xff] }
  0x31   :  { %v1172_v20 = vpack.c.bf16 %v503_v3, %v502_v15  ;;  %v536_v28 = vld [vmem:[%s2140_s3 + $0x1a0] sm:$0xff]  ;;  %v521_v36 = vld [vmem:[%s2140_s3 + $0x128] sm:$0xff]  ;;  %v506_v37 = vld [vmem:[%s2140_s3 + $0xb0] sm:$0xff] }
  0x32   :  { %1119 = vmatpush1.bf16.msra.mxu0 %v1118_v21  ;;  %v486_v21 = vld [vmem:[%s2140_s3 + $0x10] sm:$0xff]  ;;  %v507_v38 = vld [vmem:[%s2140_s3 + $0xb8] sm:$0xff]  ;;  %v508_v50 = vld [vmem:[%s2140_s3 + $0xc0] sm:$0xff] }
  0x33   :  { %1151 = vmatpush1.bf16.msra.mxu1 %v1150_v22  ;;  %1121 = vmatprep.subr.bf16.mxu0 %v1120_v23  ;;  %v487_v22 = vld [vmem:[%s2140_s3 + $0x18] sm:$0xff]  ;;  %v518_v23 = vld [vmem:[%s2140_s3 + $0x110] sm:$0xff]  ;;  %v1180_v43 = vpack.c.bf16 %v507_v38, %v506_v37  ;;  %v509_v51 = vld [vmem:[%s2140_s3 + $0xc8] sm:$0xff] }
  0x34   :  { %1153 = vmatprep.subr.bf16.mxu1 %v1152_v27  ;;  %v505_v27 = vld [vmem:[%s2140_s3 + $0xa8] sm:$0xff]  ;;  %v1174_v30 = vpack.c.bf16 %v487_v22, %v486_v21  ;;  %v1206_v31 = vpack.c.bf16 %v519_v25, %v518_v23  ;;  %v539_v40 = vld [vmem:[%s2140_s3 + $0x1b8] sm:$0xff]  ;;  %v490_v44 = vld [vmem:[%s2140_s3 + $0x30] sm:$0xff]  ;;  %v1184_v56 = vpack.c.bf16 %v509_v51, %v508_v50 }
  0x35   :  { %v1176_v32 = vpack.c.bf16 %v505_v27, %v504_v26  ;;  %v523_v49 = vld [vmem:[%s2140_s3 + $0x138] sm:$0xff]  ;;  %v541_v53 = vld [vmem:[%s2140_s3 + $0x1c8] sm:$0xff]  ;;  %v492_v57 = vld [vmem:[%s2140_s3 + $0x40] sm:$0xff] }
  0x36   :  { %1123 = vmatpush1.bf16.msra.mxu0 %v1122_v33  ;;  %v488_v33 = vld [vmem:[%s2140_s3 + $0x20] sm:$0xff]  ;;  %v525_v61 = vld [vmem:[%s2140_s3 + $0x148] sm:$0xff]  ;;  %v510_v62 = vld [vmem:[%s2140_s3 + $0xd0] sm:$0xff] }
  0x37   :  { %1155 = vmatpush1.bf16.msra.mxu1 %v1154_v34  ;;  %1125 = vmatprep.subr.bf16.mxu0 %v1124_v35  ;;  %v489_v34 = vld [vmem:[%s2140_s3 + $0x28] sm:$0xff]  ;;  %v520_v35 = vld [vmem:[%s2140_s3 + $0x120] sm:$0xff]  ;;  %v511_v63 = vld [vmem:[%s2140_s3 + $0xd8] sm:$0xff] }
  0x38   :  { %1157 = vmatprep.subr.bf16.mxu1 %v1156_v39  ;;  %v538_v39 = vld [vmem:[%s2140_s3 + $0x1b0] sm:$0xff]  ;;  %v1178_v41 = vpack.c.bf16 %v489_v34, %v488_v33  ;;  %v1210_v42 = vpack.c.bf16 %v521_v36, %v520_v35  ;;  %v543_v1 = vld [vmem:[%s2140_s3 + $0x1d8] sm:$0xff]  ;;  %v1188_v5 = vpack.c.bf16 %v511_v63, %v510_v62  ;;  %v512_v11 = vld [vmem:[%s2140_s3 + $0xe0] sm:$0xff] }
  0x39   :  { %v494_v6 = vld [vmem:[%s2140_s3 + $0x50] sm:$0xff]  ;;  %v527_v10 = vld [vmem:[%s2140_s3 + $0x158] sm:$0xff]  ;;  %v513_v12 = vld [vmem:[%s2140_s3 + $0xe8] sm:$0xff] }
  0x3a   :  { %1127 = vmatpush1.bf16.msra.mxu0 %v1126_v45  ;;  %v491_v45 = vld [vmem:[%s2140_s3 + $0x38] sm:$0xff]  ;;  %v545_v14 = vld [vmem:[%s2140_s3 + $0x1e8] sm:$0xff]  ;;  %v1192_v16 = vpack.c.bf16 %v513_v12, %v512_v11  ;;  %v546_v26 = vld [vmem:[%s2140_s3 + $0x1f0] sm:$0xff] }
  0x3b   :  { %1159 = vmatpush1.bf16.msra.mxu1 %v1158_v46  ;;  %1129 = vmatprep.subr.bf16.mxu0 %v1128_v47  ;;  %v522_v46 = vld [vmem:[%s2140_s3 + $0x130] sm:$0xff]  ;;  %v1212_v47 = vpack.c.bf16 %v539_v40, %v538_v39  ;;  %v1182_v54 = vpack.c.bf16 %v491_v45, %v490_v44  ;;  %v529_v22 = vld [vmem:[%s2140_s3 + $0x168] sm:$0xff]  ;;  %v515_v25 = vld [vmem:[%s2140_s3 + $0xf8] sm:$0xff] }
  0x3c   :  { %1161 = vmatprep.subr.bf16.mxu1 %v1160_v52  ;;  %v540_v52 = vld [vmem:[%s2140_s3 + $0x1c0] sm:$0xff]  ;;  %v1214_v55 = vpack.c.bf16 %v523_v49, %v522_v46  ;;  %v530_v33 = vld [vmem:[%s2140_s3 + $0x170] sm:$0xff]  ;;  %v531_v34 = vld [vmem:[%s2140_s3 + $0x178] sm:$0xff] }
  0x3d   :  { %v1230_v35 = vpack.c.bf16 %v531_v34, %v530_v33  ;;  %v565_v36 = vld [vmem:[%s2140_s3 + $0x288] sm:$0xff]  ;;  %v596_v37 = vld [vmem:[%s2140_s3 + $0x380] sm:$0xff] }
  0x3e   :  { %1131 = vmatpush1.bf16.msra.mxu0 %v1130_v58  ;;  %v493_v58 = vld [vmem:[%s2140_s3 + $0x48] sm:$0xff]  ;;  %v1935_v44 = vld [vmem:[%s2141_s2] sm:$0xff] }
  0x3f   :  { %1163 = vmatpush1.bf16.msra.mxu1 %v1162_v59  ;;  %1133 = vmatprep.subr.bf16.mxu0 %v1132_v60  ;;  %v524_v59 = vld [vmem:[%s2140_s3 + $0x140] sm:$0xff]  ;;  %v1216_v60 = vpack.c.bf16 %v541_v53, %v540_v52  ;;  %v1186_v2 = vpack.c.bf16 %v493_v58, %v492_v57  ;;  %v597_v39 = vld [vmem:[%s2140_s3 + $0x388] sm:$0xff] }
  0x40   :  { %1165 = vmatprep.subr.bf16.mxu1 %v1164_v0  ;;  %v542_v0 = vld [vmem:[%s2140_s3 + $0x1d0] sm:$0xff]  ;;  %v1218_v4 = vpack.c.bf16 %v525_v61, %v524_v59  ;;  %v1264_v40 = vpack.c.bf16 %v597_v39, %v596_v37  ;;  %v548_v57 = vld [vmem:[%s2140_s3 + $0x200] sm:$0xff]  ;;  %v549_v58 = vld [vmem:[%s2140_s3 + $0x208] sm:$0xff] }
  0x41   :  { %v580_v59 = vld [vmem:[%s2140_s3 + $0x300] sm:$0xff]  ;;  %v581_v63 = vld [vmem:[%s2140_s3 + $0x308] sm:$0xff]  ;;  %v586_v37 = vld [vmem:[%s2140_s3 + $0x330] sm:$0xff] }
  0x42   :  { %1135 = vmatpush1.bf16.msra.mxu0 %v1134_v7  ;;  %v495_v7 = vld [vmem:[%s2140_s3 + $0x58] sm:$0xff]  ;;  %v1266_v11 = vpack.c.bf16 %v581_v63, %v580_v59 }
  0x43   :  { %1167 = vmatpush1.bf16.msra.mxu1 %v1166_v8  ;;  %1169 = vmatprep.subr.bf16.mxu0 %v1168_v9  ;;  %v526_v8 = vld [vmem:[%s2140_s3 + $0x150] sm:$0xff]  ;;  %v1220_v9 = vpack.c.bf16 %v543_v1, %v542_v0  ;;  %v1190_v15 = vpack.c.bf16 %v495_v7, %v494_v6  ;;  %v567_v1 = vld [vmem:[%s2140_s3 + $0x298] sm:$0xff] }
  0x44   :  { %1201 = vmatprep.subr.bf16.mxu1 %v1200_v13  ;;  %v544_v13 = vld [vmem:[%s2140_s3 + $0x1e0] sm:$0xff]  ;;  %v1222_v3 = vpack.c.bf16 %v527_v10, %v526_v8  ;;  %v566_v0 = vld [vmem:[%s2140_s3 + $0x290] sm:$0xff]  ;;  %v599_v6 = vld [vmem:[%s2140_s3 + $0x398] sm:$0xff] }
  0x45   :  { %399 = vmatmul.mubr.f32.vlgmr.msra.gmra.mrb[2].mxu0 %v1561_v48  ;;  %v1224_v17 = vpack.c.bf16 %v545_v14, %v544_v13  ;;  %v1236_v12 = vpack.c.bf16 %v567_v1, %v566_v0  ;;  %v550_v13 = vld [vmem:[%s2140_s3 + $0x210] sm:$0xff]  ;;  %v551_v14 = vld [vmem:[%s2140_s3 + $0x218] sm:$0xff] }
  0x46   :  { %470 = vmatmul.mubr.f32.vlgmr.msra.gmra.mrb[2].mxu1 %v1561_v48  ;;  %1171 = vmatpush3.bf16.msra.mxu0 %v1170_v18  ;;  %v1208_v48 = vpack.c.bf16 %v537_v29, %v536_v28  ;;  %v496_v18 = vld [vmem:[%s2140_s3 + $0x60] sm:$0xff]  ;;  %v547_v28 = vld [vmem:[%s2140_s3 + $0x1f8] sm:$0xff]  ;;  %v498_v29 = vld [vmem:[%s2140_s3 + $0x70] sm:$0xff] }
  0x47   :  { %1203 = vmatpush3.bf16.msra.mxu1 %v1202_v19  ;;  %1173 = vmatprep.subr.bf16.mxu0 %v1172_v20  ;;  %v497_v19 = vld [vmem:[%s2140_s3 + $0x68] sm:$0xff]  ;;  %v528_v20 = vld [vmem:[%s2140_s3 + $0x160] sm:$0xff]  ;;  %v587_v39 = vld [vmem:[%s2140_s3 + $0x338] sm:$0xff] }
  0x48   :  { %1205 = vmatprep.subr.bf16.mxu1 %v1204_v24  ;;  %v1194_v21 = vpack.c.bf16 %v497_v19, %v496_v18  ;;  %v1226_v23 = vpack.c.bf16 %v529_v22, %v528_v20  ;;  %v514_v24 = vld [vmem:[%s2140_s3 + $0xf0] sm:$0xff]  ;;  %v569_v18 = vld [vmem:[%s2140_s3 + $0x2a8] sm:$0xff]  ;;  %v600_v19 = vld [vmem:[%s2140_s3 + $0x3a0] sm:$0xff] }
  0x49   :  { %v1196_v27 = vpack.c.bf16 %v515_v25, %v514_v24  ;;  %v601_v20 = vld [vmem:[%s2140_s3 + $0x3a8] sm:$0xff]  ;;  %v552_v24 = vld [vmem:[%s2140_s3 + $0x220] sm:$0xff]  ;;  %v559_v63 = vld [vmem:[%s2140_s3 + $0x258] sm:$0xff] }
  0x4a   :  { %1175 = vmatpush3.bf16.msra.mxu0 %v1174_v30  ;;  %v499_v30 = vld [vmem:[%s2140_s3 + $0x78] sm:$0xff]  ;;  %v553_v25 = vld [vmem:[%s2140_s3 + $0x228] sm:$0xff]  ;;  %v590_v0 = vld [vmem:[%s2140_s3 + $0x350] sm:$0xff] }
  0x4b   :  { %1207 = vmatpush3.bf16.msra.mxu1 %v1206_v31  ;;  %1177 = vmatprep.subr.bf16.mxu0 %v1176_v32  ;;  %v1228_v31 = vpack.c.bf16 %v547_v28, %v546_v26  ;;  %v1198_v32 = vpack.c.bf16 %v499_v30, %v498_v29  ;;  %v584_v26 = vld [vmem:[%s2140_s3 + $0x320] sm:$0xff]  ;;  %v585_v28 = vld [vmem:[%s2140_s3 + $0x328] sm:$0xff]  ;;  %v570_v29 = vld [vmem:[%s2140_s3 + $0x2b0] sm:$0xff]  ;;  %v1242_v33 = vpack.c.bf16 %v553_v25, %v552_v24 }
  0x4c   :  { %1209 = vmatprep.subr.bf16.mxu1 %v1208_v48  ;;  %v564_v48 = vld [vmem:[%s2140_s3 + $0x280] sm:$0xff]  ;;  %v571_v30 = vld [vmem:[%s2140_s3 + $0x2b8] sm:$0xff]  ;;  %v1274_v34 = vpack.c.bf16 %v585_v28, %v584_v26 }
  0x4d   :  { %v1232_v38 = vpack.c.bf16 %v565_v36, %v564_v48  ;;  %v554_v48 = vld [vmem:[%s2140_s3 + $0x230] sm:$0xff]  ;;  %v555_v36 = vld [vmem:[%s2140_s3 + $0x238] sm:$0xff] }
  0x4e   :  { %1179 = vmatpush3.bf16.msra.mxu0 %v1178_v41  ;;  %v152_v41 = vlaneseq }
  0x4f   :  { %1211 = vmatpush3.bf16.msra.mxu1 %v1210_v42  ;;  %1181 = vmatprep.subr.bf16.mxu0 %v1180_v43 }
  0x50   :  { %1213 = vmatprep.subr.bf16.mxu1 %v1212_v47  ;;  %v1929_v42 = vshrl.u32 %v152_v41, 7  ;;  %v573_v41 = vld [vmem:[%s2140_s3 + $0x2c8] sm:$0xff] }
  0x52   :  { %1183 = vmatpush3.bf16.msra.mxu0 %v1182_v54  ;;  %v154_v43 = vsub.s32 0, %v1929_v42  ;;  %v162_v45 = vsub.s32 2, %v1929_v42  ;;  %v158_v46 = vsub.s32 1, %v1929_v42  ;;  %v166_v47 = vsub.s32 3, %v1929_v42 }
  0x53   :  { %1215 = vmatpush3.bf16.msra.mxu1 %v1214_v55  ;;  %1185 = vmatprep.subr.bf16.mxu0 %v1184_v56 }
  0x54   :  { %1217 = vmatprep.subr.bf16.mxu1 %v1216_v60  ;;  %v155_v49 = vrot.slane %v1935_v44, %v154_v43  ;;  %v163_v50 = vrot.slane %v1935_v44, %v162_v45  ;;  %v159_v51 = vrot.slane %v1935_v44, %v158_v46  ;;  %v167_v52 = vrot.slane %v1935_v44, %v166_v47  ;;  %v604_v43 = vld [vmem:[%s2140_s3 + $0x3c0] sm:$0xff]  ;;  %v605_v45 = vld [vmem:[%s2140_s3 + $0x3c8] sm:$0xff] }
  0x55   :  { %v1246_v46 = vpack.c.bf16 %v555_v36, %v554_v48  ;;  %v1278_v47 = vpack.c.bf16 %v587_v39, %v586_v37 }
  0x56   :  { %1187 = vmatpush3.bf16.msra.mxu0 %v1186_v2 }
  0x57   :  { %1219 = vmatpush3.bf16.msra.mxu1 %v1218_v4  ;;  %1189 = vmatprep.subr.bf16.mxu0 %v1188_v5  ;;  %v598_v5 = vld [vmem:[%s2140_s3 + $0x390] sm:$0xff] }
  0x58   :  { %1221 = vmatprep.subr.bf16.mxu1 %v1220_v9  ;;  %v1234_v9 = vpack.c.bf16 %v549_v58, %v548_v57  ;;  %v606_v57 = vld [vmem:[%s2140_s3 + $0x3d0] sm:$0xff]  ;;  %v607_v58 = vld [vmem:[%s2140_s3 + $0x3d8] sm:$0xff] }
  0x59   :  { %v1284_v1 = vpack.c.bf16 %v607_v58, %v606_v57 }
  0x5a   :  { %1191 = vmatpush3.bf16.msra.mxu0 %v1190_v15  ;;  %v582_v15 = vld [vmem:[%s2140_s3 + $0x310] sm:$0xff] }
  0x5b   :  { %1223 = vmatpush3.bf16.msra.mxu1 %v1222_v3  ;;  %1193 = vmatprep.subr.bf16.mxu0 %v1192_v16  ;;  %v1268_v3 = vpack.c.bf16 %v599_v6, %v598_v5  ;;  %v583_v16 = vld [vmem:[%s2140_s3 + $0x318] sm:$0xff]  ;;  %v577_v5 = vld [vmem:[%s2140_s3 + $0x2e8] sm:$0xff]  ;;  %v608_v6 = vld [vmem:[%s2140_s3 + $0x3e0] sm:$0xff] }
  0x5c   :  { %1225 = vmatprep.subr.bf16.mxu1 %v1224_v17  ;;  %v568_v17 = vld [vmem:[%s2140_s3 + $0x2a0] sm:$0xff]  ;;  %v1270_v22 = vpack.c.bf16 %v583_v16, %v582_v15  ;;  %v593_v16 = vld [vmem:[%s2140_s3 + $0x368] sm:$0xff] }
  0x5e   :  { %1195 = vmatpush3.bf16.msra.mxu0 %v1194_v21  ;;  %v1238_v21 = vpack.c.bf16 %v551_v14, %v550_v13  ;;  %v561_v13 = vld [vmem:[%s2140_s3 + $0x268] sm:$0xff]  ;;  %v592_v14 = vld [vmem:[%s2140_s3 + $0x360] sm:$0xff] }
  0x5f   :  { %1227 = vmatpush3.bf16.msra.mxu1 %v1226_v23  ;;  %1197 = vmatprep.subr.bf16.mxu0 %v1196_v27  ;;  %v1240_v23 = vpack.c.bf16 %v569_v18, %v568_v17  ;;  %v1272_v27 = vpack.c.bf16 %v601_v20, %v600_v19  ;;  %v174_v17 = vsub.s32 5, %v1929_v42  ;;  %v578_v18 = vld [vmem:[%s2140_s3 + $0x2f0] sm:$0xff]  ;;  %v579_v19 = vld [vmem:[%s2140_s3 + $0x2f8] sm:$0xff]  ;;  %v182_v20 = vsub.s32 7, %v1929_v42 }
  0x60   :  { %1229 = vmatprep.subr.bf16.mxu1 %v1228_v31  ;;  %v602_v31 = vld [vmem:[%s2140_s3 + $0x3b0] sm:$0xff]  ;;  %v1290_v25 = vpack.c.bf16 %v593_v16, %v592_v14  ;;  %v1260_v26 = vpack.c.bf16 %v579_v19, %v578_v18 }
  0x62   :  { %1199 = vmatpush3.bf16.msra.mxu0 %v1198_v32  ;;  %v603_v32 = vld [vmem:[%s2140_s3 + $0x3b8] sm:$0xff] }
  0x63   :  { %1231 = vmatpush3.bf16.msra.mxu1 %v1230_v35  ;;  %1233 = vmatprep.subr.bf16.mxu0 %v1232_v38  ;;  %v1244_v35 = vpack.c.bf16 %v571_v30, %v570_v29  ;;  %v1276_v38 = vpack.c.bf16 %v603_v32, %v602_v31  ;;  %v175_v29 = vrot.slane %v1935_v44, %v174_v17  ;;  %v594_v31 = vld [vmem:[%s2140_s3 + $0x370] sm:$0xff]  ;;  %v595_v32 = vld [vmem:[%s2140_s3 + $0x378] sm:$0xff] }
  0x64   :  { %1265 = vmatprep.subr.bf16.mxu1 %v1264_v40  ;;  %v572_v40 = vld [vmem:[%s2140_s3 + $0x2c0] sm:$0xff] }
  0xf8   :  { %v258_v53 = vpop.f32.mrb[0].mxu0 }
  0xf9   :  { %v259_v54 = vadd.f32 %v258_v53, %v155_v49  ;;  %v329_v55 = vpop.f32.mrb[0].mxu1  ;;  %v260_v56 = vpop.f32.mrb[1].mxu0  ;;  %v1248_v49 = vpack.c.bf16 %v573_v41, %v572_v40  ;;  %v1280_v53 = vpack.c.bf16 %v605_v45, %v604_v43 }
  0xfa   :  { %v330_v60 = vadd.f32 %v329_v55, %v163_v50  ;;  %v261_v61 = vadd.f32 %v260_v56, %v159_v51  ;;  %v331_v62 = vpop.f32.mrb[1].mxu1  ;;  %v556_v50 = vld [vmem:[%s2140_s3 + $0x240] sm:$0xff]  ;;  %v557_v51 = vld [vmem:[%s2140_s3 + $0x248] sm:$0xff]  ;;  %v574_v55 = vld [vmem:[%s2140_s3 + $0x2d0] sm:$0xff] }
  0xfb   :  { %v476_v2 = vmax.f32 %v259_v54, 0.0  ;;  %v332_v4 = vadd.f32 %v331_v62, %v167_v52  ;;  %v588_v52 = vld [vmem:[%s2140_s3 + $0x340] sm:$0xff]  ;;  %v589_v54 = vld [vmem:[%s2140_s3 + $0x348] sm:$0xff]  ;;  %v575_v56 = vld [vmem:[%s2140_s3 + $0x2d8] sm:$0xff]  ;;  %v1250_v59 = vpack.c.bf16 %v557_v51, %v556_v50  ;;  %v613_v51 = vstv %s2142_s4 }
  0xfc   :  { %v478_v7 = vmax.f32 %v330_v60, 0.0  ;;  %v477_v8 = vmax.f32 %v261_v61, 0.0  ;;  %v1282_v60 = vpack.c.bf16 %v589_v54, %v588_v52  ;;  %v1252_v61 = vpack.c.bf16 %v575_v56, %v574_v55  ;;  %v558_v62 = vld [vmem:[%s2140_s3 + $0x250] sm:$0xff] }
  0xfd   :  { %v479_v10 = vmax.f32 %v332_v4, 0.0  ;;  %v576_v4 = vld [vmem:[%s2140_s3 + $0x2e0] sm:$0xff] }
  0xfe   :  { %678 = vmatprep.mubr.f32.mxu0 %v477_v8  ;;  %v1254_v8 = vpack.c.bf16 %v559_v63, %v558_v62 }
  0xff   :  { %748 = vmatprep.mubr.f32.mxu1 %v479_v10  ;;  %679 = vmatmul.mubr.f32.vlgmr.msra.gmra.mrb[4].mxu0 %v476_v2  ;;  %v591_v2 = vld [vmem:[%s2140_s3 + $0x358] sm:$0xff]  ;;  %v1256_v10 = vpack.c.bf16 %v577_v5, %v576_v4 }
 0x100   :  { %749 = vmatmul.mubr.f32.vlgmr.msra.gmra.mrb[4].mxu1 %v478_v7  ;;  %1235 = vmatpush3.bf16.msra.mxu0 %v1234_v9  ;;  %v609_v7 = vld [vmem:[%s2140_s3 + $0x3e8] sm:$0xff]  ;;  %v1286_v9 = vpack.c.bf16 %v591_v2, %v590_v0 }
 0x101   :  { %1267 = vmatpush3.bf16.msra.mxu1 %v1266_v11  ;;  %1237 = vmatprep.subr.bf16.mxu0 %v1236_v12  ;;  %v170_v11 = vsub.s32 4, %v1929_v42  ;;  %v560_v12 = vld [vmem:[%s2140_s3 + $0x260] sm:$0xff]  ;;  %v1288_v15 = vpack.c.bf16 %v609_v7, %v608_v6 }
 0x102   :  { %1269 = vmatprep.subr.bf16.mxu1 %v1268_v3  ;;  %v178_v3 = vsub.s32 6, %v1929_v42  ;;  %v562_v42 = vld [vmem:[%s2140_s3 + $0x270] sm:$0xff] }
 0x103   :  { %v171_v24 = vrot.slane %v1935_v44, %v170_v11 }
 0x104   :  { %1239 = vmatpush3.bf16.msra.mxu0 %v1238_v21  ;;  %v610_v21 = vld [vmem:[%s2140_s3 + $0x3f0] sm:$0xff]  ;;  %v179_v28 = vrot.slane %v1935_v44, %v178_v3 }
 0x105   :  { %1271 = vmatpush3.bf16.msra.mxu1 %v1270_v22  ;;  %1241 = vmatprep.subr.bf16.mxu0 %v1240_v23  ;;  %v611_v22 = vld [vmem:[%s2140_s3 + $0x3f8] sm:$0xff]  ;;  %v1258_v23 = vpack.c.bf16 %v561_v13, %v560_v12 }
 0x106   :  { %1273 = vmatprep.subr.bf16.mxu1 %v1272_v27  ;;  %v563_v27 = vld [vmem:[%s2140_s3 + $0x278] sm:$0xff]  ;;  %v1292_v30 = vpack.c.bf16 %v611_v22, %v610_v21 }
 0x108   :  { %1243 = vmatpush3.bf16.msra.mxu0 %v1242_v33  ;;  %v183_v33 = vrot.slane %v1935_v44, %v182_v20 }
 0x109   :  { %1275 = vmatpush3.bf16.msra.mxu1 %v1274_v34  ;;  %1245 = vmatprep.subr.bf16.mxu0 %v1244_v35  ;;  %v1262_v35 = vpack.c.bf16 %v563_v27, %v562_v42 }
 0x10a   :  { %1277 = vmatprep.subr.bf16.mxu1 %v1276_v38  ;;  %v1294_v38 = vpack.c.bf16 %v595_v32, %v594_v31 }
 0x10c   :  { %1247 = vmatpush3.bf16.msra.mxu0 %v1246_v46 }
 0x10d   :  { %1279 = vmatpush3.bf16.msra.mxu1 %v1278_v47  ;;  %1249 = vmatprep.subr.bf16.mxu0 %v1248_v49 }
 0x10e   :  { %1281 = vmatprep.subr.bf16.mxu1 %v1280_v53 }
 0x110   :  { %1251 = vmatpush3.bf16.msra.mxu0 %v1250_v59 }
 0x111   :  { %1283 = vmatpush3.bf16.msra.mxu1 %v1282_v60  ;;  %1253 = vmatprep.subr.bf16.mxu0 %v1252_v61 }
 0x112   :  { %1285 = vmatprep.subr.bf16.mxu1 %v1284_v1 }
 0x114   :  { %1255 = vmatpush3.bf16.msra.mxu0 %v1254_v8 }
 0x115   :  { %1287 = vmatpush3.bf16.msra.mxu1 %v1286_v9  ;;  %1257 = vmatprep.subr.bf16.mxu0 %v1256_v10 }
 0x116   :  { %1289 = vmatprep.subr.bf16.mxu1 %v1288_v15 }
 0x118   :  { %v400_v34 = vpop.f32.mrb[2].mxu0  ;;  %1259 = vmatpush3.bf16.msra.mxu0 %v1258_v23 }
 0x119   :  { %v401_v48 = vadd.f32 %v400_v34, %v171_v24  ;;  %v471_v36 = vpop.f32.mrb[2].mxu1  ;;  %1291 = vmatpush3.bf16.msra.mxu1 %v1290_v25  ;;  %v402_v37 = vpop.f32.mrb[3].mxu0  ;;  %1261 = vmatprep.subr.bf16.mxu0 %v1260_v26 }
 0x11a   :  { %v472_v39 = vadd.f32 %v471_v36, %v179_v28  ;;  %v403_v40 = vadd.f32 %v402_v37, %v175_v29  ;;  %v473_v41 = vpop.f32.mrb[3].mxu1  ;;  %1293 = vmatprep.subr.bf16.mxu1 %v1292_v30 }
 0x11b   :  { %v474_v43 = vadd.f32 %v473_v41, %v183_v33  ;;  %v480_v47 = vmax.f32 %v401_v48, 0.0 }
 0x11c   :  { %v482_v45 = vmax.f32 %v472_v39, 0.0  ;;  %v481_v46 = vmax.f32 %v403_v40, 0.0  ;;  %1263 = vmatpush3.bf16.msra.mxu0 %v1262_v35 }
 0x11d   :  { %v483_v49 = vmax.f32 %v474_v43, 0.0  ;;  %1295 = vmatpush3.bf16.msra.mxu1 %v1294_v38 }
 0x11e   :  { %818 = vmatprep.mubr.f32.mxu0 %v481_v46 }
 0x11f   :  { %888 = vmatprep.mubr.f32.mxu1 %v483_v49  ;;  %819 = vmatmul.mubr.f32.vlgmr.msra.gmra.mrb[6].mxu0 %v480_v47 }
 0x120   :  { %889 = vmatmul.mubr.f32.vlgmr.msra.gmra.mrb[6].mxu1 %v482_v45 }
 0x1d2   :  { %v932_v44 = vpop.f32.mrb[4].mxu0 }
 0x1d3   :  { %v967_v50 = vpop.f32.mrb[4].mxu1  ;;  %v933_v52 = vpop.f32.mrb[5].mxu0 }
 0x1d4   :  { %v934_v53 = vadd.f32 %v933_v52, %v932_v44  ;;  %v968_v54 = vpop.f32.mrb[5].mxu1 }
 0x1d5   :  { %v969_v55 = vadd.f32 %v968_v54, %v967_v50 }
 0x1d6   :  { %v681_v56 = vadd.f32 %v934_v53, %v613_v51 }
 0x1d8   :  { %v751_v57 = vadd.f32 %v969_v55, %v681_v56 }
 0x1f2   :  { %v1002_v58 = vpop.f32.mrb[6].mxu0 }
 0x1f3   :  { %v1037_v59 = vpop.f32.mrb[6].mxu1  ;;  %v1003_v60 = vpop.f32.mrb[7].mxu0 }
 0x1f4   :  { %v1004_v61 = vadd.f32 %v1003_v60, %v1002_v58  ;;  %v1038_v62 = vpop.f32.mrb[7].mxu1 }
 0x1f5   :  { %v1039_v63 = vadd.f32 %v1038_v62, %v1037_v59 }
 0x1f6   :  { %v821_v0 = vadd.f32 %v1004_v61, %v751_v57 }
 0x1f8   :  { %v891_v1 = vadd.f32 %v1039_v63, %v821_v0 }
 0x1fa   :  { %895 = vst.msk [vmem:[%s2143_s5] sm:$0xff] %vm894_vm0, %v891_v1 }

</bundles_post_ra>
